<compile_context>
chip_gen: v7x
topology: tpu7x:2x2x1
jax: 0.10.0
libtpu: 0.0.40
codegen_flags: <defaults>
</compile_context>

<pallas_src>
import jax
import jax.numpy as jnp
from jax.experimental import pallas as pl
from jax.experimental.pallas import tpu as pltpu


def dummy_embedder_kernel(tf_ref, wb_ref, o_ref):
    # tf_ref: (TB, F)   wb_ref: (8, Ep) [rows 0..F-1 = W_eff, row F = b_eff]
    # o_ref:  (TB, Ep)
    tf = tf_ref[...]
    wb = wb_ref[...]
    F = tf.shape[1]

    # Bias-initialized accumulator + K broadcast-FMAs on the VPU (no MXU).
    acc = wb[F:F + 1, :] + tf[:, 0:1] * wb[0:1, :]
    for k in range(1, F):
        acc = acc + tf[:, k:k + 1] * wb[k:k + 1, :]

    o_ref[...] = acc.astype(o_ref.dtype)


def dummy_embedder(temporal_features, w_embed, b_embed, w_fusion, b_fusion,
                   *, tb=None):
    B, F = temporal_features.shape          # F == 4 temporal features
    E = w_embed.shape[1]

    # ---- Algebraic fold (pure JAX, outside the kernel; weights are static).
    # w_fusion rows are grouped [feature0 block | feature1 | feature2 | feature3]
    # matching the concat order of the original module; it is the pre-transposed
    # (4E, E) view of nn.Linear(4E, E).weight.
    wf_blocks = w_fusion.reshape(F, E, E)                       # (F, E, E)
    w_eff = jnp.einsum('ke,kef->kf', w_embed, wf_blocks)        # (F, E)
    b_eff = (jnp.einsum('ke,kef->f', b_embed, wf_blocks)
             + b_fusion.reshape(-1))                            # (E,)

    # ---- Lane-dense padding of the embedding dim (multiple of 128 lanes) and
    #      packing W_eff + b_eff into one sublane-aligned (8, Ep) slab.
    Ep = ((E + 127) // 128) * 128
    wb = jnp.zeros((8, Ep), jnp.float32)
    wb = wb.at[:F, :E].set(w_eff)
    wb = wb.at[F, :E].set(b_eff)

    # ---- Batch tiling (multiple of 8 sublanes, capped for v7x VMEM headroom).
    if tb is None:
        tb = min(512, ((B + 7) // 8) * 8)
    Bp = pl.cdiv(B, tb) * tb
    tf = temporal_features
    if Bp != B:
        tf = jnp.pad(tf, ((0, Bp - B), (0, 0)))

    out = pl.pallas_call(
        dummy_embedder_kernel,
        out_shape=jax.ShapeDtypeStruct((Bp, Ep), jnp.float32),
        grid=(Bp // tb,),
        in_specs=[
            pl.BlockSpec((tb, F), lambda i: (i, 0)),   # batch-tiled features
            pl.BlockSpec((8, Ep), lambda i: (0, 0)),   # VMEM-resident params
        ],
        out_specs=pl.BlockSpec((tb, Ep), lambda i: (i, 0)),
        compiler_params=pltpu.CompilerParams(
            dimension_semantics=("parallel",)),
    )(tf, wb)

    return out[:B, :E]


def reference_forward(temporal_features, w_embed, b_embed, w_fusion, b_fusion):
    # Pure-JAX reference mirroring the PyTorch module (eval mode), un-folded.
    embs = [temporal_features[:, k:k + 1] * w_embed[k:k + 1, :] + b_embed[k:k + 1, :]
            for k in range(4)]
    cat = jnp.concatenate(embs, axis=1)
    return cat @ w_fusion + b_fusion


if __name__ == "__main__":
    B = 8           # batch
    E = 32          # embedding_dim

    key = jax.random.PRNGKey(0)
    k_tf, k_we, k_be, k_wf, k_bf = jax.random.split(key, 5)

    # Deterministic synthetic parameters (shapes follow the nn.Module __init__).
    temporal_features = jax.random.normal(k_tf, (B, 4), dtype=jnp.float32)
    w_embed = jax.random.normal(k_we, (4, E), dtype=jnp.float32) * 0.1   # 4x Linear(1,E) weights
    b_embed = jax.random.normal(k_be, (4, E), dtype=jnp.float32) * 0.1   # 4x Linear(1,E) biases
    # nn.Linear(4E, E).weight has shape (E, 4E); store it pre-transposed as (4E, E)
    # with rows grouped per source feature (matching the concat order).
    w_fusion = jax.random.normal(k_wf, (4 * E, E), dtype=jnp.float32) * 0.05
    b_fusion = jax.random.normal(k_bf, (1, E), dtype=jnp.float32) * 0.1

    out = dummy_embedder(temporal_features, w_embed, b_embed, w_fusion, b_fusion)
    out = jax.block_until_ready(out)

    ref = reference_forward(temporal_features, w_embed, b_embed, w_fusion, b_fusion)
    assert out.shape == (B, E)
    assert jnp.allclose(out, ref, atol=1e-5, rtol=1e-5)

    print("KERNEL_OK")
</pallas_src>

<mosaic_0001>
module attributes {stable_mosaic.version = 11 : i64} {
  func.func @dummy_embedder_kernel(%arg0: i32, %arg1: memref<8x4xf32, #tpu.memory_space<vmem>>, %arg2: memref<8x128xf32, #tpu.memory_space<vmem>>, %arg3: memref<8x128xf32, #tpu.memory_space<vmem>>) attributes {dimension_semantics = [#tpu.dimension_semantics<parallel>], iteration_bounds = array<i64: 1>, scalar_prefetch = 0 : i64, scratch_operands = 0 : i64, tpu.core_type = #tpu.core_type<tc>, window_params = [{transform_indices = @transform_0, window_bounds = array<i64: 8, 4>}, {pipeline_mode = #tpu.pipeline_mode<synchronous>, transform_indices = @transform_1, window_bounds = array<i64: 8, 128>}, {transform_indices = @transform_2, window_bounds = array<i64: 8, 128>}]} {
    %c0 = arith.constant 0 : index
    %c0_0 = arith.constant 0 : index
    %0 = vector.load %arg1[%c0, %c0_0] : memref<8x4xf32, #tpu.memory_space<vmem>>, vector<8x4xf32>
    %c0_1 = arith.constant 0 : index
    %c0_2 = arith.constant 0 : index
    %1 = vector.load %arg2[%c0_1, %c0_2] : memref<8x128xf32, #tpu.memory_space<vmem>>, vector<8x128xf32>
    %2 = vector.extract_strided_slice %1 {offsets = [4, 0], sizes = [1, 128], strides = [1, 1]} : vector<8x128xf32> to vector<1x128xf32>
    %3 = vector.extract_strided_slice %0 {offsets = [0, 0], sizes = [8, 1], strides = [1, 1]} : vector<8x4xf32> to vector<8x1xf32>
    %4 = vector.extract_strided_slice %1 {offsets = [0, 0], sizes = [1, 128], strides = [1, 1]} : vector<8x128xf32> to vector<1x128xf32>
    %5 = vector.broadcast %3 : vector<8x1xf32> to vector<8x128xf32>
    %6 = vector.broadcast %4 : vector<1x128xf32> to vector<8x128xf32>
    %7 = arith.mulf %5, %6 : vector<8x128xf32>
    %8 = vector.broadcast %2 : vector<1x128xf32> to vector<8x128xf32>
    %9 = arith.addf %8, %7 : vector<8x128xf32>
    %10 = vector.extract_strided_slice %0 {offsets = [0, 1], sizes = [8, 1], strides = [1, 1]} : vector<8x4xf32> to vector<8x1xf32>
    %11 = vector.extract_strided_slice %1 {offsets = [1, 0], sizes = [1, 128], strides = [1, 1]} : vector<8x128xf32> to vector<1x128xf32>
    %12 = vector.broadcast %10 : vector<8x1xf32> to vector<8x128xf32>
    %13 = vector.broadcast %11 : vector<1x128xf32> to vector<8x128xf32>
    %14 = arith.mulf %12, %13 : vector<8x128xf32>
    %15 = arith.addf %9, %14 : vector<8x128xf32>
    %16 = vector.extract_strided_slice %0 {offsets = [0, 2], sizes = [8, 1], strides = [1, 1]} : vector<8x4xf32> to vector<8x1xf32>
    %17 = vector.extract_strided_slice %1 {offsets = [2, 0], sizes = [1, 128], strides = [1, 1]} : vector<8x128xf32> to vector<1x128xf32>
    %18 = vector.broadcast %16 : vector<8x1xf32> to vector<8x128xf32>
    %19 = vector.broadcast %17 : vector<1x128xf32> to vector<8x128xf32>
    %20 = arith.mulf %18, %19 : vector<8x128xf32>
    %21 = arith.addf %15, %20 : vector<8x128xf32>
    %22 = vector.extract_strided_slice %0 {offsets = [0, 3], sizes = [8, 1], strides = [1, 1]} : vector<8x4xf32> to vector<8x1xf32>
    %23 = vector.extract_strided_slice %1 {offsets = [3, 0], sizes = [1, 128], strides = [1, 1]} : vector<8x128xf32> to vector<1x128xf32>
    %24 = vector.broadcast %22 : vector<8x1xf32> to vector<8x128xf32>
    %25 = vector.broadcast %23 : vector<1x128xf32> to vector<8x128xf32>
    %26 = arith.mulf %24, %25 : vector<8x128xf32>
    %27 = arith.addf %21, %26 : vector<8x128xf32>
    %c0_3 = arith.constant 0 : index
    %c0_4 = arith.constant 0 : index
    %28 = vector.load %arg3[%c0_3, %c0_4] : memref<8x128xf32, #tpu.memory_space<vmem>>, vector<8x128xf32>
    tpu.vector_store %arg3[%c0_3, %c0_4], %27 {strides = array<i32>} : memref<8x128xf32, #tpu.memory_space<vmem>>, vector<8x128xf32>,
    return
  }
  func.func @transform_0(%arg0: i32) -> (i32, i32) {
    %c0_i32 = arith.constant 0 : i32
    %c0_i32_0 = arith.constant 0 : i32
    return %arg0, %c0_i32 : i32, i32
  }
  func.func @transform_1(%arg0: i32) -> (i32, i32) {
    %c0_i32 = arith.constant 0 : i32
    %c0_i32_0 = arith.constant 0 : i32
    %c0_i32_1 = arith.constant 0 : i32
    return %c0_i32, %c0_i32_0 : i32, i32
  }
  func.func @transform_2(%arg0: i32) -> (i32, i32) {
    %c0_i32 = arith.constant 0 : i32
    %c0_i32_0 = arith.constant 0 : i32
    return %arg0, %c0_i32 : i32, i32
  }
}

</mosaic_0001>

<bundles_post_ra>
// kernel: tpu_custom_call.1
= control target key start
LH: loop header
LB: loop body
LE: loop exit
PB: predicated region body
PF: predicated region fallthrough
CT: control target
= control target key end

     0   :  { %v108_v1 = vmov 0   ;;  %v109_v2 = vmov 2   ;;  %s146_s0 = inlined_call_operand.vmem [shape: f32[8,4], index: 0, kind: input, shape index: {}]   ;;  %s147_s1 = inlined_call_operand.vmem [shape: f32[8,128], index: 1, kind: input, shape index: {}]   ;;  %s148_s2 = inlined_call_operand.hbm [shape: f32[8,128], index: 2, kind: output, shape index: {}]  }
   0x1   :  { %v12_v0 = vld [vmem:[%s146_s0] sm:$0xff]  ;;  %79 = vset.pattern.permute.xlu0 %v108_v1  ;;  %81 = vset.pattern.permute.xlu1 %v109_v2 }
   0x2   :  { %7 = vsyncpa [#allocation3], 0  ;;  %16 = vperm.xlu0 %79, %v12_v0   ;;  %40 = vperm.xlu1 %81, %v12_v0   ;;  %v110_v3 = vmov 1   ;;  %v111_v4 = vmov 3   ;;  %v19_v5 = vlaneseq  ;;  %v13_v8 = vld [vmem:[%s147_s1] sm:$0xff]  ;;  %s112_s0 = smov [#allocation2]  }
   0x3   :  { %s66_s1 = sshll.u32 %s112_s0, 4  ;;  %s67_s1 = int_to_ptr.vmem [resolvable:$true] %s66_s1 }
   0x4   :  { %v20_v6 = vshrl.u32 %v19_v5, 7  ;;  %s84_s13 = scalar_lea.vmem %s67_s1, 128  ;;  %p89_p1 = scmp.lt.s32.totalorder %s67_s1, %s67_s1 }
   0x5   :  { %p85_p0 = scmp.ne.s32.totalorder %s67_s1, %s84_s13  ;;  %p90_p2 = scmp.lt.s32.totalorder %s84_s13, %s84_s13 }
   0x6   :  { %80 = vset.pattern.permute.xlu0 %v110_v3  ;;  %82 = vset.pattern.permute.xlu1 %v111_v4  ;;  %v21_v7 = vsub.s32 0, %v20_v6  ;;  %v26_v10 = vsub.s32 4, %v20_v6  ;;  %v35_v11 = vsub.s32 1, %v20_v6  ;;  %v45_v13 = vsub.s32 2, %v20_v6 }
   0x7   :  { %30 = vperm.xlu0 %80, %v12_v0   ;;  %50 = vperm.xlu1 %82, %v12_v0   ;;  %v55_v15 = vsub.s32 3, %v20_v6  ;;  %p91_p3 = por %p90_p2, %p89_p1 }
   0x8   :  { %v22_v9 = vrot.slane %v13_v8, %v21_v7  ;;  %v27_v16 = vrot.slane %v13_v8, %v26_v10  ;;  %v36_v18 = vrot.slane %v13_v8, %v35_v11  ;;  %v46_v19 = vrot.slane %v13_v8, %v45_v13 }
   0x9   :  { %v56_v20 = vrot.slane %v13_v8, %v55_v15  ;;  %p92_p4 = pnand %p91_p3, %p85_p0 }
   0xb   :  { %83 = vset.pattern.permute.xlu0 %v111_v4 }
  0x81   :  { %v17_v12 = vpop.permute.xlu0 %16  ;;  %v41_v14 = vpop.permute.xlu1 %40 }
  0x82   :  { %v23_v17 = vmul.f32 %v22_v9, %v17_v12  ;;  %v47_v25 = vmul.f32 %v46_v19, %v41_v14 }
  0x84   :  { %v28_v23 = vadd.f32 %v27_v16, %v23_v17 }
  0x86   :  { %v31_v21 = vpop.permute.xlu0 %30  ;;  %v51_v22 = vpop.permute.xlu1 %50 }
  0x87   :  { %v37_v24 = vmul.f32 %v36_v18, %v31_v21  ;;  %v57_v27 = vmul.f32 %v56_v20, %v51_v22 }
  0x89   :  { %v38_v26 = vadd.f32 %v37_v24, %v28_v23 }
  0x8b   :  { %v48_v28 = vadd.f32 %v47_v25, %v38_v26 }
  0x8d   :  { %v58_v29 = vadd.f32 %v57_v27, %v48_v28 }
  0x8f   :  { %59 = vst [vmem:[#allocation2] sm:$0xff] %v58_v29 }
  0x90   :  { %95 = shalt.err (!%p92_p4)
}
  0x91   :  { %s96_s16 = scalar_lea.hbm %s148_s2, 128 }
  0x92   :  { %p97_p5 = scmp.ne.s32.totalorder %s148_s2, %s96_s16  ;;  %p100_p6 = scmp.lt.u32.totalorder %s96_s16, %s148_s2 }
  0x94   :  { %p102_p7 = pnand %p100_p6, %p97_p5 }
  0x96   :  { %105 = shalt.err (!%p102_p7)
}
  0x97   :  { %69 = dma.vmem_to_hbm [thread:$0]  %s67_s1, 128, %s148_s2, [#allocation3]  }
  0x98   :  { %106 = dma.done.wait [#allocation3], 128  }
  0x99   :  { %107 = vsyncadd [#allocation3], 4294967168 }
  0x9a   :  { %73 = vsyncpa [#allocation3], 1 }

</bundles_post_ra>
